<compile_context>
chip_gen: v5e
topology: v5e:2x2
jax: 0.10.0
libtpu: 0.0.40
codegen_flags: <defaults>
</compile_context>

<pallas_src>
import math

import jax
import jax.numpy as jnp
from jax.experimental import pallas as pl
from jax.experimental.pallas import tpu as pltpu

_MIB = 1024 * 1024


# ----------------------------------------------------------------------------
# Kernels
# ----------------------------------------------------------------------------
def _linear_kernel_fused(x_ref, w_ref, b_ref, o_ref):
    """Single K step: fuse matmul, bias add and cast into one write."""
    o_ref[...] = (
        jnp.dot(x_ref[...], w_ref[...], preferred_element_type=jnp.float32)
        + b_ref[...].astype(jnp.float32)
    ).astype(o_ref.dtype)


def _linear_kernel_f32(x_ref, w_ref, b_ref, o_ref):
    """Multi-step reduction, f32 output: accumulate in place in the resident
    output block (its block index does not depend on the k grid axis)."""
    k = pl.program_id(2)

    @pl.when(k == 0)
    def _():
        # Bias broadcast doubles as the accumulator init (no separate zero-fill,
        # no epilogue bias add).
        o_ref[...] = jnp.broadcast_to(b_ref[...].astype(o_ref.dtype), o_ref.shape)

    o_ref[...] += jnp.dot(x_ref[...], w_ref[...], preferred_element_type=jnp.float32)


def _linear_kernel_scratch(x_ref, w_ref, b_ref, o_ref, acc_ref):
    """Multi-step reduction, non-f32 output: accumulate in an f32 VMEM scratch."""
    k = pl.program_id(2)

    @pl.when(k == 0)
    def _():
        acc_ref[...] = jnp.broadcast_to(b_ref[...].astype(jnp.float32), acc_ref.shape)

    acc_ref[...] += jnp.dot(x_ref[...], w_ref[...], preferred_element_type=jnp.float32)

    @pl.when(k == pl.num_programs(2) - 1)
    def _():
        o_ref[...] = acc_ref[...].astype(o_ref.dtype)


# ----------------------------------------------------------------------------
# Tile selection / VMEM budgeting
# ----------------------------------------------------------------------------
def _round_up(v, m):
    return ((v + m - 1) // m) * m


def _pick_tile(dim, unit, cap):
    """Largest multiple of `unit` (<= cap) that evenly divides round_up(dim, unit)."""
    padded = _round_up(dim, unit)
    best = unit
    t = unit
    limit = min(cap, padded)
    while t <= limit:
        if padded % t == 0:
            best = t
        t += unit
    return best, _round_up(dim, best)


def _tpu_config():
    """Per-generation tile caps and VMEM budgets."""
    vmem_cap = None
    try:
        vmem_cap = int(getattr(pltpu.get_tpu_info(), "vmem_capacity_bytes"))
    except Exception:
        vmem_cap = None
    if vmem_cap is None or vmem_cap <= 64 * _MIB:
        # v7x (64 MiB per TensorCore) or unknown: stay conservative, and never
        # raise the scoped VMEM limit above what v7x physically has.
        return dict(tm_cap=256, tn_cap=512, tk_cap=512,
                    tile_budget=40 * _MIB, vmem_limit=48 * _MIB)
    # v5e / v6e: 128 MiB physical VMEM; raise the scoped limit, keep headroom.
    return dict(tm_cap=512, tn_cap=512, tk_cap=1024,
                tile_budget=80 * _MIB, vmem_limit=96 * _MIB)


def _select_tiles(M, K, N, itemsize, cfg):
    tm_cap, tn_cap, tk_cap = cfg["tm_cap"], cfg["tn_cap"], cfg["tk_cap"]
    budget = cfg["tile_budget"]
    while True:
        tm, Mp = _pick_tile(M, 8, tm_cap)
        tk, Kp = _pick_tile(K, 128, tk_cap)
        tn, Np = _pick_tile(N, 128, tn_cap)
        # Double-buffered x / w / bias tiles + double-buffered output tile
        # + (worst case) f32 scratch accumulator.
        footprint = (2 * (tm * tk + tk * tn + tn) * itemsize
                     + 2 * tm * tn * itemsize
                     + tm * tn * 4)
        if footprint <= budget or (tk_cap <= 128 and tm_cap <= 8 and tn_cap <= 128):
            return tm, tk, tn, Mp, Kp, Np
        if tk_cap > 128:
            tk_cap //= 2
        elif tm_cap > 8:
            tm_cap //= 2
        else:
            tn_cap //= 2


# ----------------------------------------------------------------------------
# Wrapper
# ----------------------------------------------------------------------------
def linear_pallas(x, weight, bias=None):
    """y = x @ weight + bias via a tiled Pallas TPU matmul kernel."""
    if x.ndim == 1:
        x = x.reshape((1, x.shape[0]))
    M, K = x.shape
    K2, N = weight.shape
    assert K == K2, f"in_features mismatch: {K} vs {K2}"

    out_dtype = x.dtype  # output follows the activation dtype (PyTorch-like)
    cfg = _tpu_config()
    itemsize = max(x.dtype.itemsize, weight.dtype.itemsize)
    tm, tk, tn, Mp, Kp, Np = _select_tiles(M, K, N, itemsize, cfg)

    # Zero-padding is safe: padded K rows contribute 0 to the dot, padded
    # M rows / N cols are sliced off below.
    if Mp != M or Kp != K:
        x = jnp.pad(x, ((0, Mp - M), (0, Kp - K)))
    if Kp != K or Np != N:
        weight = jnp.pad(weight, ((0, Kp - K), (0, Np - N)))
    if bias is None:
        bias2d = jnp.zeros((1, Np), dtype=out_dtype)
    else:
        bias2d = jnp.pad(bias.astype(out_dtype), (0, Np - N)).reshape((1, Np))

    # M outermost / K innermost: the (K x N) weight panel (the dominant HBM
    # traffic when M is modest) is streamed ceil(M / tm) times with tm maxed.
    grid = (Mp // tm, Np // tn, Kp // tk)
    nk = grid[2]

    if nk == 1:
        kernel = _linear_kernel_fused
        scratch_shapes = []
    elif out_dtype == jnp.float32:
        kernel = _linear_kernel_f32
        scratch_shapes = []
    else:
        kernel = _linear_kernel_scratch
        scratch_shapes = [pltpu.VMEM((tm, tn), jnp.float32)]

    cost = pl.CostEstimate(
        flops=2 * Mp * Np * Kp,
        transcendentals=0,
        bytes_accessed=(x.dtype.itemsize * Mp * Kp
                        + weight.dtype.itemsize * Kp * Np
                        + out_dtype.itemsize * Mp * Np),
    )

    out = pl.pallas_call(
        kernel,
        out_shape=jax.ShapeDtypeStruct((Mp, Np), out_dtype),
        grid_spec=pltpu.PrefetchScalarGridSpec(
            num_scalar_prefetch=0,
            grid=grid,
            in_specs=[
                pl.BlockSpec((tm, tk), lambda i, j, k: (i, k)),   # x tile
                pl.BlockSpec((tk, tn), lambda i, j, k: (k, j)),   # weight tile
                pl.BlockSpec((1, tn), lambda i, j, k: (0, j)),    # bias tile
            ],
            out_specs=pl.BlockSpec((tm, tn), lambda i, j, k: (i, j)),
            scratch_shapes=scratch_shapes,
        ),
        compiler_params=pltpu.CompilerParams(
            dimension_semantics=("parallel", "parallel", "arbitrary"),
            vmem_limit_bytes=cfg["vmem_limit"],
        ),
        cost_estimate=cost,
    )(x, weight, bias2d)

    if Mp != M or Np != N:
        out = out[:M, :N]
    return out


class LinearPallas:
    """JAX/Pallas port of the PyTorch `Linear` module (forward only)."""

    def __init__(self, in_features, out_features, bias=True, *, key=None):
        self.in_features = in_features
        self.out_features = out_features
        bound = math.sqrt(1.0 / in_features)
        if key is None:
            key = jax.random.PRNGKey(0)
        wkey, bkey = jax.random.split(key)
        # U(-sqrt(k), sqrt(k)) init, matching the PyTorch module.
        self.weight = jax.random.uniform(
            wkey, (in_features, out_features), jnp.float32, -bound, bound
        )
        self.bias = None
        if bias:
            self.bias = jax.random.uniform(
                bkey, (out_features,), jnp.float32, -bound, bound
            )

    def __call__(self, x):
        return linear_pallas(x, self.weight, self.bias)


if __name__ == "__main__":
    key = jax.random.PRNGKey(0)
    k1, k2, k3, k4 = jax.random.split(key, 4)

    # Small shape (exercises K/N zero-padding + the fused single-K-step kernel).
    batch, in_features, out_features = 8, 32, 64
    x = jax.random.normal(k1, (batch, in_features), dtype=jnp.float32)
    layer = LinearPallas(in_features, out_features, bias=True, key=k2)
    y = jax.block_until_ready(layer(x))
    y_ref = jnp.dot(x, layer.weight, precision=jax.lax.Precision.HIGHEST) + layer.bias
    assert y.shape == (batch, out_features)
    assert jnp.allclose(y, y_ref, atol=1e-5, rtol=1e-5), "small-case mismatch"

    # Larger K exercises the multi-step K reduction with in-place f32
    # accumulation into the resident output block.
    batch2, in2, out2 = 16, 2048, 256
    x2 = jax.random.normal(k3, (batch2, in2), dtype=jnp.float32)
    layer2 = LinearPallas(in2, out2, bias=True, key=k4)
    y2 = jax.block_until_ready(layer2(x2))
    y2_ref = jnp.dot(x2, layer2.weight, precision=jax.lax.Precision.HIGHEST) + layer2.bias
    assert y2.shape == (batch2, out2)
    assert jnp.allclose(y2, y2_ref, atol=1e-3, rtol=1e-3), "large-case mismatch"

    # TODO(synk): optional bf16 input/weight casting (2-4x MXU throughput on
    # v6e/v7x) is left off to preserve f32 numerics of the reference module.
    print("KERNEL_OK")
</pallas_src>

<mosaic_0001>
module attributes {stable_mosaic.version = 11 : i64} {
  func.func @_linear_kernel_fused(%arg0: i32, %arg1: i32, %arg2: i32, %arg3: memref<8x128xf32, #tpu.memory_space<vmem>>, %arg4: memref<128x128xf32, #tpu.memory_space<vmem>>, %arg5: memref<1x128xf32, #tpu.memory_space<vmem>>, %arg6: memref<8x128xf32, #tpu.memory_space<vmem>>) attributes {dimension_semantics = [#tpu.dimension_semantics<parallel>, #tpu.dimension_semantics<parallel>, #tpu.dimension_semantics<arbitrary>], iteration_bounds = array<i64: 1, 1, 1>, scalar_prefetch = 0 : i64, scratch_operands = 0 : i64, tpu.core_type = #tpu.core_type<tc>, window_params = [{transform_indices = @transform_0, window_bounds = array<i64: 8, 128>}, {transform_indices = @transform_1, window_bounds = array<i64: 128, 128>}, {transform_indices = @transform_2, window_bounds = array<i64: 1, 128>}, {transform_indices = @transform_3, window_bounds = array<i64: 8, 128>}]} {
    %c0 = arith.constant 0 : index
    %c0_0 = arith.constant 0 : index
    %0 = vector.load %arg3[%c0, %c0_0] : memref<8x128xf32, #tpu.memory_space<vmem>>, vector<8x128xf32>
    %c0_1 = arith.constant 0 : index
    %c0_2 = arith.constant 0 : index
    %1 = vector.load %arg4[%c0_1, %c0_2] : memref<128x128xf32, #tpu.memory_space<vmem>>, vector<128x128xf32>
    %cst = arith.constant dense<0.000000e+00> : vector<8x128xf32>
    %2 = tpu.matmul %0, %1, %cst {dimension_numbers = #tpu.dot_dimension_numbers<[1], [0], [0], [1], [0, 0, 1, 1], [], []>} : vector<8x128xf32>, vector<128x128xf32>, vector<8x128xf32> -> vector<8x128xf32>
    %c0_3 = arith.constant 0 : index
    %c0_4 = arith.constant 0 : index
    %3 = vector.load %arg5[%c0_3, %c0_4] : memref<1x128xf32, #tpu.memory_space<vmem>>, vector<1x128xf32>
    %4 = vector.broadcast %3 : vector<1x128xf32> to vector<8x128xf32>
    %5 = arith.addf %2, %4 : vector<8x128xf32>
    %c0_5 = arith.constant 0 : index
    %c0_6 = arith.constant 0 : index
    %6 = vector.load %arg6[%c0_5, %c0_6] : memref<8x128xf32, #tpu.memory_space<vmem>>, vector<8x128xf32>
    tpu.vector_store %arg6[%c0_5, %c0_6], %5 {strides = array<i32>} : memref<8x128xf32, #tpu.memory_space<vmem>>, vector<8x128xf32>,
    return
  }
  func.func @transform_0(%arg0: i32, %arg1: i32, %arg2: i32) -> (i32, i32) {
    %c0_i32 = arith.constant 0 : i32
    return %arg0, %arg2 : i32, i32
  }
  func.func @transform_1(%arg0: i32, %arg1: i32, %arg2: i32) -> (i32, i32) {
    %c0_i32 = arith.constant 0 : i32
    return %arg2, %arg1 : i32, i32
  }
  func.func @transform_2(%arg0: i32, %arg1: i32, %arg2: i32) -> (i32, i32) {
    %c0_i32 = arith.constant 0 : i32
    %c0_i32_0 = arith.constant 0 : i32
    return %c0_i32, %arg1 : i32, i32
  }
  func.func @transform_3(%arg0: i32, %arg1: i32, %arg2: i32) -> (i32, i32) {
    %c0_i32 = arith.constant 0 : i32
    return %arg0, %arg1 : i32, i32
  }
}

</mosaic_0001>

<bundles_post_ra>
// kernel: tpu_custom_call.1
= control target key start
LH: loop header
LB: loop body
LE: loop exit
PB: predicated region body
PF: predicated region fallthrough
CT: control target
= control target key end

     0   :  { %8 = vsyncpa [#allocation3], 0  ;;  %s226_s0 = inlined_call_operand.hbm [shape: f32[8,128], index: 0, kind: input, shape index: {}]   ;;  %s227_s1 = inlined_call_operand.hbm [shape: f32[128,128], index: 1, kind: input, shape index: {}]   ;;  %s228_s2 = inlined_call_operand.vmem [shape: f32[1,128], index: 2, kind: input, shape index: {}]   ;;  %s229_s3 = inlined_call_operand.hbm [shape: f32[8,128], index: 3, kind: output, shape index: {}]  }
   0x1   :  { %9 = vsyncpa [#allocation6], 0 }
   0x2   :  { %10 = vsyncpa [#allocation4], 0  ;;  %s16_s14 = sshll.u32 %s226_s0, 4  ;;  %s189_s15 = smov [#allocation2]   ;;  %s17_s14 = int_to_ptr.hbm [resolvable:$true] %s16_s14 }
   0x3   :  { %s18_s16 = sshll.u32 %s189_s15, 4  ;;  %s26_s19 = sshll.u32 %s227_s1, 4  ;;  %s19_s16 = int_to_ptr.vmem [resolvable:$true] %s18_s16  ;;  %s27_s19 = int_to_ptr.hbm [resolvable:$true] %s26_s19 }
   0x4   :  { %21 = dma.hbm_to_vmem [thread:$0]  %s17_s14, 128, %s19_s16, [#allocation3]  }
   0x5   :  { %s190_s20 = smov [#allocation5]   ;;  %s191_s22 = smov 128  }
   0x6   :  { %s28_s21 = sshll.u32 %s190_s20, 4  ;;  %s192_s23 = smov 8   ;;  %s29_s21 = int_to_ptr.vmem [resolvable:$true] %s28_s21 }
   0x7   :  { %34 = dma.hbm_to_vmem [thread:$0]  %s27_s19, 2048, %s29_s21, [#allocation6], %s191_s22, %s191_s22, %s192_s23  }
   0x8   :  { %183 = dma.done.wait [#allocation3], 128  }
   0x9   :  { %184 = vsyncadd [#allocation3], 4294967168 }
   0xa   :  { %185 = dma.done.wait [#allocation6], 2048  }
   0xb   :  { %186 = vsyncadd [#allocation6], 4294965248  ;;  %v61_v0 = vld [vmem:[#allocation5 + $0x78] sm:$0xff]  ;;  %v60_v1 = vld [vmem:[#allocation5 + $0x70] sm:$0xff]  ;;  %s193_s24 = smov [#allocation7]   ;;  %s94_s28 = sshll.u32 %s229_s3, 4  ;;  %s95_s28 = int_to_ptr.hbm [resolvable:$true] %s94_s28 }
   0xc   :  { %66 = vmatpush.msra.mxu0 %v61_v0  ;;  %v59_v2 = vld [vmem:[#allocation5 + $0x68] sm:$0xff]  ;;  %v58_v3 = vld [vmem:[#allocation5 + $0x60] sm:$0xff]  ;;  %v57_v4 = vld [vmem:[#allocation5 + $0x58] sm:$0xff]  ;;  %s92_s25 = sshll.u32 %s193_s24, 4  ;;  %s93_s25 = int_to_ptr.vmem [resolvable:$true] %s92_s25 }
   0xd   :  { %v56_v5 = vld [vmem:[#allocation5 + $0x50] sm:$0xff]  ;;  %v55_v6 = vld [vmem:[#allocation5 + $0x48] sm:$0xff]  ;;  %v54_v7 = vld [vmem:[#allocation5 + $0x40] sm:$0xff] }
   0xe   :  { %67 = vmatpush.msra.mxu0 %v60_v1  ;;  %v53_v8 = vld [vmem:[#allocation5 + $0x38] sm:$0xff]  ;;  %v52_v9 = vld [vmem:[#allocation5 + $0x30] sm:$0xff]  ;;  %v51_v10 = vld [vmem:[#allocation5 + $0x28] sm:$0xff] }
   0xf   :  { %v50_v11 = vld [vmem:[#allocation5 + $0x20] sm:$0xff]  ;;  %v49_v12 = vld [vmem:[#allocation5 + $0x18] sm:$0xff]  ;;  %v48_v13 = vld [vmem:[#allocation5 + $0x10] sm:$0xff] }
  0x10   :  { %68 = vmatpush.msra.mxu0 %v59_v2  ;;  %v47_v14 = vld [vmem:[#allocation5 + $0x8] sm:$0xff]  ;;  %v46_v15 = vld [vmem:[#allocation5] sm:$0xff]  ;;  %v45_v16 = vld [vmem:[#allocation2] sm:$0xff] }
  0x11   :  { %v110_v17 = vld [vmem:[%s228_s2] ss:$0 sm:$0xff] }
  0x12   :  { %69 = vmatpush.msra.mxu0 %v58_v3 }
  0x14   :  { %70 = vmatpush.msra.mxu0 %v57_v4 }
  0x16   :  { %71 = vmatpush.msra.mxu0 %v56_v5 }
  0x18   :  { %72 = vmatpush.msra.mxu0 %v55_v6 }
  0x1a   :  { %73 = vmatpush.msra.mxu0 %v54_v7 }
  0x1c   :  { %74 = vmatpush.msra.mxu0 %v53_v8 }
  0x1e   :  { %75 = vmatpush.msra.mxu0 %v52_v9 }
  0x20   :  { %76 = vmatpush.msra.mxu0 %v51_v10 }
  0x22   :  { %77 = vmatpush.msra.mxu0 %v50_v11 }
  0x24   :  { %78 = vmatpush.msra.mxu0 %v49_v12 }
  0x26   :  { %79 = vmatpush.msra.mxu0 %v48_v13 }
  0x28   :  { %80 = vmatpush.msra.mxu0 %v47_v14 }
  0x2a   :  { %81 = vmatpush.msra.mxu0 %v46_v15 }
  0x2b   :  { %82 = vmatmul.f32.vlgmr.msra.gmra.mxu0 %v45_v16 }
  0xa8   :  { %v83_v18 = vpop.f32.mrf.mxu0 }
  0xa9   :  { %v84_v19 = vadd.f32 %v110_v17, %v83_v18 }
  0xab   :  { %86 = vst [vmem:[#allocation7] sm:$0xff] %v84_v19 }
  0xac   :  { %97 = dma.vmem_to_hbm [thread:$0]  %s93_s25, 128, %s95_s28, [#allocation4]  }
  0xad   :  { %187 = dma.done.wait [#allocation4], 128  }
  0xae   :  { %188 = vsyncadd [#allocation4], 4294967168 }
  0xaf   :  { %102 = vsyncpa [#allocation3], 1 }
  0xb0   :  { %103 = vsyncpa [#allocation6], 1 }
  0xb1   :  { %104 = vsyncpa [#allocation4], 1 }

</bundles_post_ra>
